<compile_context>
chip_gen: v6e
topology: v6e:2x2x1
jax: 0.10.0
libtpu: 0.0.40
codegen_flags: <defaults>
</compile_context>

<pallas_src>
import functools

import jax
import jax.numpy as jnp
from jax.experimental import pallas as pl
from jax.experimental.pallas import tpu as pltpu

_MIB = 1024 * 1024


# ---------------------------------------------------------------------------
# Shared attention-MLP math (runs on VPU/XLU only; FLOPs are negligible).
#   avg, mx        : (C, 1) f32
#   w1a_t, w2a_t   : (C, R) f32  (first 1x1-conv weights, transposed)
#   w1b,  w2b      : (C, R) f32  (second 1x1-conv weights)
# Returns sigmoid(fc1(avg) + fc2(max)) + 1 as (C, 1), so the apply step is a
# single broadcast multiply (att * x + x == x * (sigmoid + 1)).
# ---------------------------------------------------------------------------
def _attention_from_pooled(avg, mx, w1a_t, w1b, w2a_t, w2b):
    h1 = jnp.maximum(jnp.sum(w1a_t * avg, axis=0, keepdims=True), 0.0)   # (1, R)
    a_out = jnp.sum(w1b * h1, axis=1, keepdims=True)                     # (C, 1)
    h2 = jnp.maximum(jnp.sum(w2a_t * mx, axis=0, keepdims=True), 0.0)    # (1, R)
    m_out = jnp.sum(w2b * h2, axis=1, keepdims=True)                     # (C, 1)
    return jax.nn.sigmoid(a_out + m_out) + 1.0


# ---------------------------------------------------------------------------
# Fast path: one grid step per batch element, x read from HBM exactly once.
# ---------------------------------------------------------------------------
def _ca_fused_kernel(inv_hw, x_ref, w1a_t_ref, w1b_ref, w2a_t_ref, w2b_ref,
                     o_ref):
    x = x_ref[0].astype(jnp.float32)                       # (C, HW)
    avg = jnp.sum(x, axis=1, keepdims=True) * inv_hw       # (C, 1)
    mx = jnp.max(x, axis=1, keepdims=True)                 # (C, 1)
    att = _attention_from_pooled(avg, mx, w1a_t_ref[...], w1b_ref[...],
                                 w2a_t_ref[...], w2b_ref[...])
    o_ref[0] = (x * att).astype(o_ref.dtype)


# ---------------------------------------------------------------------------
# Large-HW fallback, call 1: streamed pooling + MLP -> (B, C, 1) attention.
# Standard accumulator pattern: scratch carries sum/max over the HW-tile axis,
# output written only on the last tile.
# ---------------------------------------------------------------------------
def _ca_pool_kernel(inv_hw, hw_valid, thw, x_ref, w1a_t_ref, w1b_ref,
                    w2a_t_ref, w2b_ref, att_ref, sum_ref, max_ref):
    t = pl.program_id(1)
    num_t = pl.num_programs(1)
    xt = x_ref[0].astype(jnp.float32)                      # (C, thw)

    @pl.when(t == 0)
    def _init():
        sum_ref[...] = jnp.zeros_like(sum_ref)
        max_ref[...] = jnp.full_like(max_ref, -jnp.inf)

    # Wrapper-side zero padding of HW is neutral for the sum; mask it to -inf
    # for the max.
    lane = jax.lax.broadcasted_iota(jnp.int32, xt.shape, 1) + t * thw
    xt_masked = jnp.where(lane < hw_valid, xt, -jnp.inf)
    sum_ref[...] = sum_ref[...] + jnp.sum(xt, axis=1, keepdims=True)
    max_ref[...] = jnp.maximum(max_ref[...],
                               jnp.max(xt_masked, axis=1, keepdims=True))

    @pl.when(t == num_t - 1)
    def _finalize():
        avg = sum_ref[...] * inv_hw
        att_ref[0] = _attention_from_pooled(avg, max_ref[...], w1a_t_ref[...],
                                            w1b_ref[...], w2a_t_ref[...],
                                            w2b_ref[...])


# ---------------------------------------------------------------------------
# Large-HW fallback, call 2: apply the attention vector tile by tile.
# ---------------------------------------------------------------------------
def _ca_apply_kernel(x_ref, att_ref, o_ref):
    xt = x_ref[0].astype(jnp.float32)                      # (C, thw)
    o_ref[0] = (xt * att_ref[0]).astype(o_ref.dtype)


# ---------------------------------------------------------------------------
# Generation-aware VMEM sizing.
# ---------------------------------------------------------------------------
def _vmem_capacity_bytes():
    try:
        return int(pltpu.get_tpu_info().vmem_capacity_bytes)
    except Exception:
        return 64 * _MIB            # v7x-safe default if the query is unavailable


def _vmem_budget():
    """Returns (vmem_limit_bytes, tile_budget_bytes, max_lane_cols)."""
    cap = _vmem_capacity_bytes()
    if cap >= 96 * _MIB:            # v5e / v6e: 128 MiB physical VMEM
        return 96 * _MIB, 64 * _MIB, 16384
    return 48 * _MIB, 24 * _MIB, 4096   # v7x: 64 MiB physical VMEM


def _pick_hw_tile(hw, c, itemsize, tile_budget, max_cols):
    """Largest multiple-of-128 lane tile that fits the budget; prefers exact
    divisors of HW (no padding)."""
    per_col = 4 * itemsize * max(c, 1)       # in + out, double-buffered
    cols = max(128, min(max_cols, tile_budget // per_col))
    thw = max(128, (cols // 128) * 128)
    for cand in range(thw, 127, -128):
        if hw % cand == 0:
            return cand
    return thw                               # ragged: wrapper pads HW


# ---------------------------------------------------------------------------
# Wrappers.
# ---------------------------------------------------------------------------
def _channel_attention_singlepass(x3, p, vmem_limit):
    B, C, HW = x3.shape
    R = p["w1a_t"].shape[1]
    kernel = functools.partial(_ca_fused_kernel, 1.0 / HW)
    return pl.pallas_call(
        kernel,
        out_shape=jax.ShapeDtypeStruct((B, C, HW), x3.dtype),
        grid_spec=pltpu.PrefetchScalarGridSpec(
            num_scalar_prefetch=0,
            grid=(B,),
            in_specs=[
                pl.BlockSpec((1, C, HW), lambda b: (b, 0, 0)),
                pl.BlockSpec((C, R), lambda b: (0, 0)),
                pl.BlockSpec((C, R), lambda b: (0, 0)),
                pl.BlockSpec((C, R), lambda b: (0, 0)),
                pl.BlockSpec((C, R), lambda b: (0, 0)),
            ],
            out_specs=pl.BlockSpec((1, C, HW), lambda b: (b, 0, 0)),
        ),
        compiler_params=pltpu.CompilerParams(
            dimension_semantics=("parallel",),
            vmem_limit_bytes=vmem_limit,
        ),
    )(x3, p["w1a_t"], p["w1b"], p["w2a_t"], p["w2b"])


def _channel_attention_multipass(x3, p, thw, vmem_limit):
    B, C, HW = x3.shape
    R = p["w1a_t"].shape[1]
    num_t = pl.cdiv(HW, thw)
    HWp = num_t * thw
    if HWp != HW:
        x3 = jnp.pad(x3, ((0, 0), (0, 0), (0, HWp - HW)))   # zeros: sum-neutral

    pool_kernel = functools.partial(_ca_pool_kernel, 1.0 / HW, HW, thw)
    att = pl.pallas_call(
        pool_kernel,
        out_shape=jax.ShapeDtypeStruct((B, C, 1), jnp.float32),
        grid_spec=pltpu.PrefetchScalarGridSpec(
            num_scalar_prefetch=0,
            grid=(B, num_t),
            in_specs=[
                pl.BlockSpec((1, C, thw), lambda b, t: (b, 0, t)),
                pl.BlockSpec((C, R), lambda b, t: (0, 0)),
                pl.BlockSpec((C, R), lambda b, t: (0, 0)),
                pl.BlockSpec((C, R), lambda b, t: (0, 0)),
                pl.BlockSpec((C, R), lambda b, t: (0, 0)),
            ],
            out_specs=pl.BlockSpec((1, C, 1), lambda b, t: (b, 0, 0)),
            scratch_shapes=[
                pltpu.VMEM((C, 1), jnp.float32),   # running sum
                pltpu.VMEM((C, 1), jnp.float32),   # running max
            ],
        ),
        compiler_params=pltpu.CompilerParams(
            dimension_semantics=("parallel", "arbitrary"),
            vmem_limit_bytes=vmem_limit,
        ),
    )(x3, p["w1a_t"], p["w1b"], p["w2a_t"], p["w2b"])

    out3 = pl.pallas_call(
        _ca_apply_kernel,
        out_shape=jax.ShapeDtypeStruct((B, C, HWp), x3.dtype),
        grid_spec=pltpu.PrefetchScalarGridSpec(
            num_scalar_prefetch=0,
            grid=(B, num_t),
            in_specs=[
                pl.BlockSpec((1, C, thw), lambda b, t: (b, 0, t)),
                pl.BlockSpec((1, C, 1), lambda b, t: (b, 0, 0)),
            ],
            out_specs=pl.BlockSpec((1, C, thw), lambda b, t: (b, 0, t)),
        ),
        compiler_params=pltpu.CompilerParams(
            dimension_semantics=("parallel", "parallel"),
            vmem_limit_bytes=vmem_limit,
        ),
    )(x3, att)

    if HWp != HW:
        out3 = out3[:, :, :HW]
    return out3


def channel_attention_forward(x, params, *, force_multipass=False,
                              force_hw_tile=None):
    """x: (B, C, H, W) in NCHW, any float dtype; output has x's dtype."""
    B, C, H, W = x.shape
    HW = H * W
    x3 = x.reshape(B, C, HW)                      # free layout change, no transpose
    vmem_limit, tile_budget, max_cols = _vmem_budget()
    itemsize = x3.dtype.itemsize

    # Single-pass if one batch slab (in + out, double buffered) fits the budget.
    slab_bytes = 4 * itemsize * C * HW
    if slab_bytes <= tile_budget and not force_multipass:
        out3 = _channel_attention_singlepass(x3, params, vmem_limit)
    else:
        thw = force_hw_tile if force_hw_tile is not None else _pick_hw_tile(
            HW, C, itemsize, tile_budget, max_cols)
        out3 = _channel_attention_multipass(x3, params, thw, vmem_limit)
    return out3.reshape(B, C, H, W)


# ---------------------------------------------------------------------------
# Parameters & pure-JAX reference.
# ---------------------------------------------------------------------------
def make_params(key, in_planes):
    """Random ChannelAttention parameters (PyTorch 1x1 convs, bias=False)."""
    red = in_planes // 16                      # the module hard-codes // 16
    assert red >= 1, "in_planes must be >= 16"
    k = jax.random.split(key, 4)
    sa = 1.0 / jnp.sqrt(jnp.float32(in_planes))
    sb = 1.0 / jnp.sqrt(jnp.float32(red))
    w1a = sa * jax.random.normal(k[0], (red, in_planes), jnp.float32)   # fc1 conv1
    w1b = sb * jax.random.normal(k[1], (in_planes, red), jnp.float32)   # fc1 conv2
    w2a = sa * jax.random.normal(k[2], (red, in_planes), jnp.float32)   # fc2 conv1
    w2b = sb * jax.random.normal(k[3], (in_planes, red), jnp.float32)   # fc2 conv2
    return {
        # raw weights (pure-JAX reference)
        "w1a": w1a, "w1b": w1b, "w2a": w2a, "w2b": w2b,
        # kernel layout: first-layer weights transposed so both MLP layers are
        # (C, R) broadcast-multiply + reduce (no tiny MXU matmuls/transposes).
        "w1a_t": jnp.transpose(w1a), "w2a_t": jnp.transpose(w2a),
    }


def channel_attention_reference(x, p):
    """Pure-JAX f32 reference of the PyTorch forward pass."""
    avg = jnp.mean(x, axis=(2, 3))                          # (B, C)
    mx = jnp.max(x, axis=(2, 3))                            # (B, C)
    a_out = jnp.maximum(avg @ p["w1a"].T, 0.0) @ p["w1b"].T
    m_out = jnp.maximum(mx @ p["w2a"].T, 0.0) @ p["w2b"].T
    att = jax.nn.sigmoid(a_out + m_out)[:, :, None, None]
    return att * x + x


if __name__ == "__main__":
    key = jax.random.PRNGKey(0)

    # Case 1: small feature map, single-pass fast path.
    # Case 2: larger non-multiple-of-128 HW, still single-pass.
    # Case 3: forced multipass fallback with a ragged (padded+masked) last tile.
    cases = [
        ((2, 64, 16, 16), False, None),
        ((2, 32, 40, 40), False, None),
        ((2, 32, 40, 40), True, 512),
    ]
    for (B, C, H, W), force_mp, thw in cases:
        kx, kp = jax.random.split(jax.random.fold_in(key, C * H + int(force_mp)))
        x = jax.random.normal(kx, (B, C, H, W), jnp.float32)
        params = make_params(kp, C)

        out = jax.block_until_ready(
            channel_attention_forward(x, params, force_multipass=force_mp,
                                      force_hw_tile=thw))
        ref = jax.block_until_ready(channel_attention_reference(x, params))

        assert out.shape == x.shape and out.dtype == x.dtype
        # f32 end-to-end now (no boundary bf16 cast) -> tight tolerance.
        assert jnp.allclose(out, ref, atol=1e-4, rtol=1e-4), (
            "max abs err", float(jnp.max(jnp.abs(out - ref))))

    print("KERNEL_OK")
</pallas_src>

<mosaic_0001>
module attributes {stable_mosaic.version = 11 : i64} {
  func.func @_ca_fused_kernel(%arg0: i32, %arg1: memref<1x64x256xf32, #tpu.memory_space<vmem>>, %arg2: memref<64x4xf32, #tpu.memory_space<vmem>>, %arg3: memref<64x4xf32, #tpu.memory_space<vmem>>, %arg4: memref<64x4xf32, #tpu.memory_space<vmem>>, %arg5: memref<64x4xf32, #tpu.memory_space<vmem>>, %arg6: memref<1x64x256xf32, #tpu.memory_space<vmem>>) attributes {dimension_semantics = [#tpu.dimension_semantics<parallel>], iteration_bounds = array<i64: 2>, scalar_prefetch = 0 : i64, scratch_operands = 0 : i64, tpu.core_type = #tpu.core_type<tc>, window_params = [{transform_indices = @transform_0, window_bounds = array<i64: 1, 64, 256>}, {pipeline_mode = #tpu.pipeline_mode<synchronous>, transform_indices = @transform_1, window_bounds = array<i64: 64, 4>}, {pipeline_mode = #tpu.pipeline_mode<synchronous>, transform_indices = @transform_2, window_bounds = array<i64: 64, 4>}, {pipeline_mode = #tpu.pipeline_mode<synchronous>, transform_indices = @transform_3, window_bounds = array<i64: 64, 4>}, {pipeline_mode = #tpu.pipeline_mode<synchronous>, transform_indices = @transform_4, window_bounds = array<i64: 64, 4>}, {transform_indices = @transform_5, window_bounds = array<i64: 1, 64, 256>}]} {
    %c0 = arith.constant 0 : index
    %c0_0 = arith.constant 0 : index
    %c0_1 = arith.constant 0 : index
    %0 = vector.load %arg1[%c0, %c0_0, %c0_1] : memref<1x64x256xf32, #tpu.memory_space<vmem>>, vector<1x64x256xf32>
    %1 = vector.shape_cast %0 : vector<1x64x256xf32> to vector<64x256xf32>
    %cst = arith.constant dense<0.000000e+00> : vector<64xf32>
    %2 = vector.multi_reduction <add>, %1, %cst [1] : vector<64x256xf32> to vector<64xf32>
    %3 = vector.shape_cast %2 : vector<64xf32> to vector<64x1xf32>
    %cst_2 = arith.constant 3.906250e-03 : f32
    %4 = vector.broadcast %cst_2 : f32 to vector<64x1xf32>
    %5 = arith.mulf %3, %4 : vector<64x1xf32>
    %cst_3 = arith.constant dense<0xFF800000> : vector<64xf32>
    %6 = vector.multi_reduction <maximumf>, %1, %cst_3 [1] : vector<64x256xf32> to vector<64xf32>
    %7 = vector.shape_cast %6 : vector<64xf32> to vector<64x1xf32>
    %c0_4 = arith.constant 0 : index
    %c0_5 = arith.constant 0 : index
    %8 = vector.load %arg2[%c0_4, %c0_5] : memref<64x4xf32, #tpu.memory_space<vmem>>, vector<64x4xf32>
    %c0_6 = arith.constant 0 : index
    %c0_7 = arith.constant 0 : index
    %9 = vector.load %arg3[%c0_6, %c0_7] : memref<64x4xf32, #tpu.memory_space<vmem>>, vector<64x4xf32>
    %c0_8 = arith.constant 0 : index
    %c0_9 = arith.constant 0 : index
    %10 = vector.load %arg4[%c0_8, %c0_9] : memref<64x4xf32, #tpu.memory_space<vmem>>, vector<64x4xf32>
    %c0_10 = arith.constant 0 : index
    %c0_11 = arith.constant 0 : index
    %11 = vector.load %arg5[%c0_10, %c0_11] : memref<64x4xf32, #tpu.memory_space<vmem>>, vector<64x4xf32>
    %12 = vector.broadcast %5 : vector<64x1xf32> to vector<64x4xf32>
    %13 = arith.mulf %8, %12 : vector<64x4xf32>
    %cst_12 = arith.constant dense<0.000000e+00> : vector<4xf32>
    %14 = vector.multi_reduction <add>, %13, %cst_12 [0] : vector<64x4xf32> to vector<4xf32>
    %15 = vector.shape_cast %14 : vector<4xf32> to vector<1x4xf32>
    %cst_13 = arith.constant 0.000000e+00 : f32
    %16 = vector.broadcast %cst_13 : f32 to vector<1x4xf32>
    %17 = arith.maximumf %15, %16 : vector<1x4xf32>
    %18 = vector.broadcast %17 : vector<1x4xf32> to vector<64x4xf32>
    %19 = arith.mulf %9, %18 : vector<64x4xf32>
    %cst_14 = arith.constant dense<0.000000e+00> : vector<64xf32>
    %20 = vector.multi_reduction <add>, %19, %cst_14 [1] : vector<64x4xf32> to vector<64xf32>
    %21 = vector.shape_cast %20 : vector<64xf32> to vector<64x1xf32>
    %22 = vector.broadcast %7 : vector<64x1xf32> to vector<64x4xf32>
    %23 = arith.mulf %10, %22 : vector<64x4xf32>
    %cst_15 = arith.constant dense<0.000000e+00> : vector<4xf32>
    %24 = vector.multi_reduction <add>, %23, %cst_15 [0] : vector<64x4xf32> to vector<4xf32>
    %25 = vector.shape_cast %24 : vector<4xf32> to vector<1x4xf32>
    %cst_16 = arith.constant 0.000000e+00 : f32
    %26 = vector.broadcast %cst_16 : f32 to vector<1x4xf32>
    %27 = arith.maximumf %25, %26 : vector<1x4xf32>
    %28 = vector.broadcast %27 : vector<1x4xf32> to vector<64x4xf32>
    %29 = arith.mulf %11, %28 : vector<64x4xf32>
    %cst_17 = arith.constant dense<0.000000e+00> : vector<64xf32>
    %30 = vector.multi_reduction <add>, %29, %cst_17 [1] : vector<64x4xf32> to vector<64xf32>
    %31 = vector.shape_cast %30 : vector<64xf32> to vector<64x1xf32>
    %32 = arith.addf %21, %31 : vector<64x1xf32>
    %33 = arith.negf %32 : vector<64x1xf32>
    %34 = math.exp %33 : vector<64x1xf32>
    %cst_18 = arith.constant 1.000000e+00 : f32
    %35 = vector.broadcast %cst_18 : f32 to vector<64x1xf32>
    %36 = arith.addf %35, %34 : vector<64x1xf32>
    %37 = arith.divf %35, %36 : vector<64x1xf32>
    %cst_19 = arith.constant 1.000000e+00 : f32
    %38 = vector.broadcast %cst_19 : f32 to vector<64x1xf32>
    %39 = arith.addf %37, %38 : vector<64x1xf32>
    %40 = vector.broadcast %39 : vector<64x1xf32> to vector<64x256xf32>
    %41 = arith.mulf %1, %40 : vector<64x256xf32>
    %c0_20 = arith.constant 0 : index
    %c0_21 = arith.constant 0 : index
    %c0_22 = arith.constant 0 : index
    %42 = vector.load %arg6[%c0_20, %c0_21, %c0_22] : memref<1x64x256xf32, #tpu.memory_space<vmem>>, vector<1x64x256xf32>
    %43 = vector.shape_cast %42 : vector<1x64x256xf32> to vector<64x256xf32>
    %44 = vector.shape_cast %41 : vector<64x256xf32> to vector<1x64x256xf32>
    tpu.vector_store %arg6[%c0_20, %c0_21, %c0_22], %44 {strides = array<i32>} : memref<1x64x256xf32, #tpu.memory_space<vmem>>, vector<1x64x256xf32>,
    return
  }
  func.func @transform_0(%arg0: i32) -> (i32, i32, i32) {
    %c0_i32 = arith.constant 0 : i32
    %c0_i32_0 = arith.constant 0 : i32
    %c0_i32_1 = arith.constant 0 : i32
    return %arg0, %c0_i32, %c0_i32_0 : i32, i32, i32
  }
  func.func @transform_1(%arg0: i32) -> (i32, i32) {
    %c0_i32 = arith.constant 0 : i32
    %c0_i32_0 = arith.constant 0 : i32
    %c0_i32_1 = arith.constant 0 : i32
    return %c0_i32, %c0_i32_0 : i32, i32
  }
  func.func @transform_2(%arg0: i32) -> (i32, i32) {
    %c0_i32 = arith.constant 0 : i32
    %c0_i32_0 = arith.constant 0 : i32
    %c0_i32_1 = arith.constant 0 : i32
    return %c0_i32, %c0_i32_0 : i32, i32
  }
  func.func @transform_3(%arg0: i32) -> (i32, i32) {
    %c0_i32 = arith.constant 0 : i32
    %c0_i32_0 = arith.constant 0 : i32
    %c0_i32_1 = arith.constant 0 : i32
    return %c0_i32, %c0_i32_0 : i32, i32
  }
  func.func @transform_4(%arg0: i32) -> (i32, i32) {
    %c0_i32 = arith.constant 0 : i32
    %c0_i32_0 = arith.constant 0 : i32
    %c0_i32_1 = arith.constant 0 : i32
    return %c0_i32, %c0_i32_0 : i32, i32
  }
  func.func @transform_5(%arg0: i32) -> (i32, i32, i32) {
    %c0_i32 = arith.constant 0 : i32
    %c0_i32_0 = arith.constant 0 : i32
    %c0_i32_1 = arith.constant 0 : i32
    return %arg0, %c0_i32, %c0_i32_0 : i32, i32, i32
  }
}

</mosaic_0001>

<bundles_post_ra>
// kernel: tpu_custom_call.1
= control target key start
LH: loop header
LB: loop body
LE: loop exit
PB: predicated region body
PF: predicated region fallthrough
CT: control target
= control target key end

     0   :  { %10 = vsyncpa [#allocation3], 0  ;;  %s1165_s0 = inlined_call_operand.vmem [shape: f32[2,64,256], index: 0, kind: input, shape index: {}]   ;;  %s1166_s1 = inlined_call_operand.vmem [shape: f32[64,4], index: 1, kind: input, shape index: {}]   ;;  %s1167_s2 = inlined_call_operand.vmem [shape: f32[64,4], index: 2, kind: input, shape index: {}]   ;;  %s1168_s3 = inlined_call_operand.vmem [shape: f32[64,4], index: 3, kind: input, shape index: {}]   ;;  %s1169_s4 = inlined_call_operand.vmem [shape: f32[64,4], index: 4, kind: input, shape index: {}]   ;;  %s1170_s5 = inlined_call_operand.hbm [shape: f32[2,64,256], index: 5, kind: output, shape index: {}]  }
   0x1   :  { %12 = vsyncpa [#allocation3 + $0x1], 0  ;;  %s814_s18 = smov 0   ;;  %s816_s19 = smov 0  }
   0x2   :  { %s818_s20 = smov 0   ;;  %s820_s21 = smov 0  }
   0x3 LB: > { %s835_s22 = sadd.s32 4294967295, %s779_s21   ;;  %s624_s23 = sadd.s32 4294967294, %s779_s21   ;;  %s779_s21 = sphi %s820_s21, %s1176_s21   ;;  %s775_s20 = sphi %s818_s20, %s1175_s20   ;;  %s771_s19 = sphi %s816_s19, %s1174_s19   ;;  %s767_s18 = sphi %s814_s18, %s1173_s18  }
   0x4   : > { %s839_s24 = sadd.s32 1, %s779_s21   ;;  %s135_s25 = sadd.s32 1, %s775_s20 }
   0x5   : > { %s132_s26 = ssub.s32 %s779_s21, %s839_s24  ;;  %p145_p0 = scmp.ne.s32.totalorder %s775_s20, %s771_s19 }
   0x6   : > { %p133_p1 = scmp.eq.s32.totalorder %s132_s26, 0  ;;  %p146_p2 = scmp.eq.s32.totalorder %s835_s22, 1 }
   0x7   : > { %p151_p3 = scmp.ne.s32.totalorder %s771_s19, %s767_s18  ;;  %p152_p4 = scmp.eq.s32.totalorder %s624_s23, 1 }
   0x8   : > { %s850_s27 = scalar_select %p133_p1, %s775_s20, %s135_s25  }
   0x9   : > { %p852_p5 = por %p146_p2, %p145_p0  ;;  %p856_p6 = por %p152_p4, %p151_p3 }
   0xa   : > { %p627_p7 = scmp.ge.s32.totalorder %s779_s21, 1  ;;  %p190_p8 = scmp.lt.s32.totalorder %s779_s21, 3 }
   0xc   : > { %p191_p9 = pnand %p627_p7, %p190_p8 }
   0xd   : > { %p218_p10 = scmp.lt.s32.totalorder (!%p191_p9), %s835_s22, 1  ;;  %s215_s10 = sand.u32 (!%p191_p9), 1, %s771_s19  }
   0xe   : > { %194 = sbr.rel (%p191_p9) target bundleno = 438 (0x1b6), region = 40  ;;  %s628_s11 = sshll.u32 (!%p191_p9), %s215_s10, 7 }
   0xf   : > { %s1084_s12 = scalar_lea.vmem (!%p191_p9), [#allocation2], %s628_s11  ;;  %s645_s13 = sshll.u32 (!%p191_p9), %s835_s22, 11 }
  0x10   : > { %s562_s14 = sshll.u32 (!%p191_p9), %s1084_s12, 4  ;;  %s1113_s17 = scalar_lea.hbm (!%p191_p9), %s1170_s5, %s645_s13  ;;  %s1115_s14 = int_to_ptr.vmem [resolvable:$true] %s562_s14 }
  0x11   : > { %s719_s23 = scalar_lea.vmem (!%p191_p9), %s1115_s14, 2048  ;;  %s781_s25 = smov (!%p191_p9), [#allocation2]  }
  0x12   : > { %p720_p11 = scmp.ne.s32.totalorder (!%p191_p9), %s1115_s14, %s719_s23  ;;  %s723_s26 = sshll.u32 (!%p191_p9), %s781_s25, 4  ;;  %s724_s26 = int_to_ptr.vmem [resolvable:$false] %s723_s26 }
  0x13   : > { %s219_s30 = scalar_select %p218_p10, %s835_s22, 1  ;;  %v296_v36 = vld [vmem:[%s1166_s1 + $0x8] sm:$0xff]  ;;  %v295_v38 = vld [vmem:[%s1166_s1] sm:$0xff]  ;;  %v297_v45 = vld [vmem:[%s1166_s1 + $0x10] sm:$0xff]  ;;  %vm335_vm0 = vcmask 31744  }
  0x14   : > { %v298_v48 = vld [vmem:[%s1166_s1 + $0x18] sm:$0xff]  ;;  %v312_v52 = vld [vmem:[%s1168_s3 + $0x8] sm:$0xff]  ;;  %v299_v56 = vld [vmem:[%s1166_s1 + $0x20] sm:$0xff]  ;;  %s1125_s22 = scalar_lea.sflag [#allocation3], %s215_s10  ;;  %p721_p12 = pnand %p720_p11, %p852_p5 }
  0x15   : > { %s644_s6 = sshll.u32 %s219_s30, 7  ;;  %v311_v57 = vld [vmem:[%s1168_s3] sm:$0xff]  ;;  %v313_v59 = vld [vmem:[%s1168_s3 + $0x10] sm:$0xff]  ;;  %v300_v61 = vld [vmem:[%s1166_s1 + $0x28] sm:$0xff]  ;;  %s725_s30 = scalar_lea.vmem %s724_s26, 4096 }
  0x16   : > { %s867_s9 = scalar_lea.vmem %s1165_s0, %s644_s6  ;;  %p722_p13 = pneg %p721_p12 }
  0x17   : > { %v870_v0 = vld [vmem:[%s867_s9 + $0x20] sm:$0xff]  ;;  %v873_v1 = vld [vmem:[%s867_s9 + $0x28] sm:$0xff]  ;;  %v884_v5 = vld [vmem:[%s867_s9 + $0x10] sm:$0xff]  ;;  %p726_p0 = scmp.lt.s32.totalorder %s1115_s14, %s724_s26  ;;  %p727_p1 = scmp.lt.s32.totalorder %s725_s30, %s719_s23 }
  0x18   : > { %v876_v2 = vld [vmem:[%s867_s9] sm:$0xff]  ;;  %v245_v3 = vadd.f32 %v873_v1, %v870_v0  ;;  %v881_v4 = vld [vmem:[%s867_s9 + $0x8] sm:$0xff]  ;;  %v887_v6 = vld [vmem:[%s867_s9 + $0x18] sm:$0xff]  ;;  %v277_v17 = vmax.f32 %v870_v0, %v873_v1 }
  0x19   : > { %v239_v7 = vadd.f32 %v881_v4, %v876_v2  ;;  %v271_v8 = vmax.f32 %v876_v2, %v881_v4  ;;  %v242_v9 = vadd.f32 %v887_v6, %v884_v5  ;;  %v896_v10 = vld [vmem:[%s867_s9 + $0x30] sm:$0xff]  ;;  %v899_v11 = vld [vmem:[%s867_s9 + $0x38] sm:$0xff]  ;;  %v274_v13 = vmax.f32 %v884_v5, %v887_v6  ;;  %v906_v14 = vld [vmem:[%s867_s9 + $0x40] sm:$0xff]  ;;  %p728_p2 = por %p727_p1, %p726_p0 }
  0x1a   : > { %246 = vadd.xlane.f32.xlu1 %v245_v3  ;;  %v248_v12 = vadd.f32 %v899_v11, %v896_v10  ;;  %v909_v15 = vld [vmem:[%s867_s9 + $0x48] sm:$0xff]  ;;  %v916_v18 = vld [vmem:[%s867_s9 + $0x50] sm:$0xff]  ;;  %v919_v19 = vld [vmem:[%s867_s9 + $0x58] sm:$0xff]  ;;  %v280_v21 = vmax.f32 %v896_v10, %v899_v11 }
  0x1b   : > { %240 = vadd.xlane.f32.xlu0 %v239_v7  ;;  %v251_v16 = vadd.f32 %v909_v15, %v906_v14  ;;  %v254_v20 = vadd.f32 %v919_v19, %v916_v18  ;;  %v926_v22 = vld [vmem:[%s867_s9 + $0x60] sm:$0xff]  ;;  %v929_v23 = vld [vmem:[%s867_s9 + $0x68] sm:$0xff]  ;;  %v283_v25 = vmax.f32 %v906_v14, %v909_v15  ;;  %v936_v26 = vld [vmem:[%s867_s9 + $0x70] sm:$0xff]  ;;  %v286_v29 = vmax.f32 %v916_v18, %v919_v19  ;;  %p729_p3 = pnand %p728_p2, %p722_p13 }
  0x1c   : > { %v257_v24 = vadd.f32 %v929_v23, %v926_v22  ;;  %v939_v27 = vld [vmem:[%s867_s9 + $0x78] sm:$0xff]  ;;  %v289_v31 = vmax.f32 %v926_v22, %v929_v23 }
  0x1d   : > { %v260_v28 = vadd.f32 %v939_v27, %v936_v26  ;;  %v292_v30 = vmax.f32 %v936_v26, %v939_v27 }
  0x1e   : > { %272 = vmax.xlane.f32.xlu1 %v271_v8  ;;  %v314_v8 = vld [vmem:[%s1168_s3 + $0x18] sm:$0xff] }
  0x1f   : > { %243 = vadd.xlane.f32.xlu0 %v242_v9 }
  0x22   : > { %249 = vadd.xlane.f32.xlu1 %v248_v12 }
  0x23   : > { %275 = vmax.xlane.f32.xlu0 %v274_v13 }
  0x26   : > { %252 = vadd.xlane.f32.xlu1 %v251_v16 }
  0x27   : > { %278 = vmax.xlane.f32.xlu0 %v277_v17 }
  0x2a   : > { %255 = vadd.xlane.f32.xlu1 %v254_v20 }
  0x2b   : > { %281 = vmax.xlane.f32.xlu0 %v280_v21  ;;  %v315_v21 = vld [vmem:[%s1168_s3 + $0x20] sm:$0xff] }
  0x2e   : > { %258 = vadd.xlane.f32.xlu1 %v257_v24 }
  0x2f   : > { %284 = vmax.xlane.f32.xlu0 %v283_v25 }
  0x32   : > { %261 = vadd.xlane.f32.xlu1 %v260_v28  ;;  %v301_v28 = vld [vmem:[%s1166_s1 + $0x30] sm:$0xff] }
  0x33   : > { %287 = vmax.xlane.f32.xlu0 %v286_v29 }
  0x36   : > { %293 = vmax.xlane.f32.xlu1 %v292_v30 }
  0x37   : > { %290 = vmax.xlane.f32.xlu0 %v289_v31 }
  0xa3   : > { %v247_v32 = vpop.xlane.xlu1 %246 }
  0xa4   : > { %v241_v33 = vpop.xlane.xlu0 %240  ;;  %v265_v42 = vmul.f32 0.00390625, %v247_v32 }
  0xa5   : > { %v263_v35 = vmul.f32 0.00390625, %v241_v33 }
  0xa6   : > { %v329_v50 = vmul.f32 %v297_v45, %v265_v42 }
  0xa7   : > { %v273_v34 = vpop.xlane.xlu1 %272  ;;  %v327_v43 = vmul.f32 %v295_v38, %v263_v35 }
  0xa8   : > { %v244_v37 = vpop.xlane.xlu0 %243  ;;  %v339_v63 = vsel %vm335_vm0, %v329_v50, 0.0  ;;  %v390_v12 = vmul.f32 %v311_v57, %v273_v34 }
  0xa9   : > { %v264_v39 = vmul.f32 0.00390625, %v244_v37  ;;  %v336_v51 = vsel %vm335_vm0, %v327_v43, 0.0  ;;  %v302_v43 = vld [vmem:[%s1166_s1 + $0x38] sm:$0xff] }
  0xaa   : > { %v398_v33 = vsel %vm335_vm0, %v390_v12, 0.0 }
  0xab   : > { %v328_v40 = vmul.f32 %v296_v36, %v264_v39  ;;  %v250_v41 = vpop.xlane.xlu1 %249 }
  0xac   : > { %v276_v44 = vpop.xlane.xlu0 %275  ;;  %v266_v47 = vmul.f32 0.00390625, %v250_v41 }
  0xad   : > { %v337_v46 = vsel %vm335_vm0, %v328_v40, 0.0  ;;  %v391_v60 = vmul.f32 %v312_v52, %v276_v44  ;;  %v316_v40 = vld [vmem:[%s1168_s3 + $0x28] sm:$0xff]  ;;  %v318_v52 = vld [vmem:[%s1168_s3 + $0x38] sm:$0xff] }
  0xae   : > { %v338_v55 = vadd.f32 %v337_v46, %v336_v51  ;;  %v330_v58 = vmul.f32 %v298_v48, %v266_v47 }
  0xaf   : > { %v253_v49 = vpop.xlane.xlu1 %252  ;;  %v399_v24 = vsel %vm335_vm0, %v391_v60, 0.0 }
  0xb0   : > { %v267_v53 = vmul.f32 0.00390625, %v253_v49  ;;  %v279_v54 = vpop.xlane.xlu0 %278  ;;  %v340_v13 = vadd.f32 %v339_v63, %v338_v55  ;;  %v341_v17 = vsel %vm335_vm0, %v330_v58, 0.0  ;;  %v400_v37 = vadd.f32 %v399_v24, %v398_v33  ;;  %v317_v55 = vld [vmem:[%s1168_s3 + $0x30] sm:$0xff]  ;;  %v320_v33 = vld [vmem:[%s1169_s4 + $0x8] sm:$0xff] }
  0xb1   : > { %v392_v16 = vmul.f32 %v313_v59, %v279_v54 }
  0xb2   : > { %v331_v3 = vmul.f32 %v299_v56, %v267_v53  ;;  %v342_v34 = vadd.f32 %v341_v17, %v340_v13 }
  0xb3   : > { %v256_v62 = vpop.xlane.xlu1 %255  ;;  %v401_v35 = vsel %vm335_vm0, %v392_v16, 0.0 }
  0xb4   : > { %v268_v7 = vmul.f32 0.00390625, %v256_v62  ;;  %v282_v9 = vpop.xlane.xlu0 %281  ;;  %v343_v30 = vsel %vm335_vm0, %v331_v3, 0.0  ;;  %v402_v45 = vadd.f32 %v401_v35, %v400_v37  ;;  %v321_v37 = vld [vmem:[%s1169_s4 + $0x10] sm:$0xff] }
  0xb5   : > { %v393_v25 = vmul.f32 %v314_v8, %v282_v9  ;;  %v344_v41 = vadd.f32 %v343_v30, %v342_v34  ;;  %v319_v34 = vld [vmem:[%s1169_s4] sm:$0xff] }
  0xb6   : > { %v332_v20 = vmul.f32 %v300_v61, %v268_v7 }
  0xb7   : > { %v259_v29 = vpop.xlane.xlu1 %258  ;;  %v403_v42 = vsel %vm335_vm0, %v393_v25, 0.0 }
  0xb8   : > { %v269_v31 = vmul.f32 0.00390625, %v259_v29  ;;  %v285_v32 = vpop.xlane.xlu0 %284  ;;  %v345_v38 = vsel %vm335_vm0, %v332_v20, 0.0  ;;  %v404_v53 = vadd.f32 %v403_v42, %v402_v45  ;;  %v324_v45 = vld [vmem:[%s1169_s4 + $0x28] sm:$0xff] }
  0xb9   : > { %v394_v36 = vmul.f32 %v315_v21, %v285_v32  ;;  %v346_v49 = vadd.f32 %v345_v38, %v344_v41 }
  0xba   : > { %v333_v39 = vmul.f32 %v301_v28, %v269_v31 }
  0xbb   : > { %v262_v44 = vpop.xlane.xlu1 %261  ;;  %v405_v50 = vsel %vm335_vm0, %v394_v36, 0.0  ;;  %v322_v36 = vld [vmem:[%s1169_s4 + $0x18] sm:$0xff] }
  0xbc   : > { %v347_v46 = vsel %vm335_vm0, %v333_v39, 0.0  ;;  %v270_v47 = vmul.f32 0.00390625, %v262_v44  ;;  %v288_v48 = vpop.xlane.xlu0 %287  ;;  %v406_v59 = vadd.f32 %v405_v50, %v404_v53  ;;  %v303_v53 = vld [vmem:[%s1167_s2] sm:$0xff] }
  0xbd   : > { %v395_v51 = vmul.f32 %v316_v40, %v288_v48  ;;  %v348_v56 = vadd.f32 %v347_v46, %v346_v49  ;;  %v323_v46 = vld [vmem:[%s1169_s4 + $0x20] sm:$0xff] }
  0xbe   : > { %v334_v54 = vmul.f32 %v302_v43, %v270_v47 }
  0xbf   : > { %v407_v57 = vsel %vm335_vm0, %v395_v51, 0.0  ;;  %v294_v58 = vpop.xlane.xlu1 %293 }
  0xc0   : > { %v349_v60 = vsel %vm335_vm0, %v334_v54, 0.0  ;;  %v291_v61 = vpop.xlane.xlu0 %290  ;;  %v397_v62 = vmul.f32 %v318_v52, %v294_v58  ;;  %v408_v7 = vadd.f32 %v407_v57, %v406_v59  ;;  %v304_v52 = vld [vmem:[%s1167_s2 + $0x8] sm:$0xff]  ;;  %v306_v58 = vld [vmem:[%s1167_s2 + $0x18] sm:$0xff]  ;;  %v305_v59 = vld [vmem:[%s1167_s2 + $0x10] sm:$0xff] }
  0xc1   : > { %v350_v63 = vadd.f32 %v349_v60, %v348_v56  ;;  %v396_v3 = vmul.f32 %v317_v55, %v291_v61 }
  0xc2   : > { %v411_v12 = vsel %vm335_vm0, %v397_v62, 0.0 }
  0xc3   : > { %v351_v8 = vrot.slane %v350_v63, 4  ;;  %v409_v9 = vsel %vm335_vm0, %v396_v3, 0.0  ;;  %v308_v3 = vld [vmem:[%s1167_s2 + $0x28] sm:$0xff] }
  0xc4   : > { %v410_v13 = vadd.f32 %v409_v9, %v408_v7  ;;  %v307_v7 = vld [vmem:[%s1167_s2 + $0x20] sm:$0xff] }
  0xc5   : > { %v352_v17 = vadd.f32 %v351_v8, %v350_v63 }
  0xc6   : > { %v412_v16 = vadd.f32 %v411_v12, %v410_v13 }
  0xc7   : > { %v353_v24 = vrot.slane %v352_v17, 2 }
  0xc8   : > { %v413_v20 = vrot.slane %v412_v16, 4 }
  0xc9   : > { %v354_v29 = vadd.f32 %v353_v24, %v352_v17  ;;  %v309_v17 = vld [vmem:[%s1167_s2 + $0x30] sm:$0xff] }
  0xca   : > { %v414_v21 = vadd.f32 %v413_v20, %v412_v16  ;;  %v310_v16 = vld [vmem:[%s1167_s2 + $0x38] sm:$0xff] }
  0xcb   : > { %v355_v32 = vrot.slane %v354_v29, 1 }
  0xcc   : > { %v415_v25 = vrot.slane %v414_v21, 2 }
  0xcd   : > { %v356_v40 = vadd.f32 %v355_v32, %v354_v29  ;;  %v325_v29 = vld [vmem:[%s1169_s4 + $0x30] sm:$0xff] }
  0xce   : > { %v416_v28 = vadd.f32 %v415_v25, %v414_v21 }
  0xcf   : > { %v357_v47 = vmax.f32 %v356_v40, 0.0 }
  0xd0   : > { %v417_v30 = vrot.slane %v416_v28, 1 }
  0xd1   : > { %v359_v56 = vmul.f32 %v357_v47, %v304_v52  ;;  %v358_v57 = vmul.f32 %v357_v47, %v303_v53  ;;  %v361_v62 = vmul.f32 %v357_v47, %v306_v58  ;;  %v360_v63 = vmul.f32 %v357_v47, %v305_v59 }
  0xd2   : > { %v418_v31 = vadd.f32 %v417_v30, %v416_v28  ;;  %v363_v12 = vmul.f32 %v357_v47, %v308_v3  ;;  %v362_v13 = vmul.f32 %v357_v47, %v307_v7  ;;  %v365_v24 = vmul.f32 %v357_v47, %v310_v16  ;;  %v326_v28 = vld [vmem:[%s1169_s4 + $0x38] sm:$0xff] }
  0xd3   : > { %v369_v60 = vsel %vm335_vm0, %v359_v56, 0.0  ;;  %v366_v61 = vsel %vm335_vm0, %v358_v57, 0.0  ;;  %v375_v8 = vsel %vm335_vm0, %v361_v62, 0.0  ;;  %v372_v9 = vsel %vm335_vm0, %v360_v63, 0.0 }
  0xd4   : > { %v419_v35 = vmax.f32 %v418_v31, 0.0  ;;  %v381_v20 = vsel %vm335_vm0, %v363_v12, 0.0  ;;  %v378_v21 = vsel %vm335_vm0, %v362_v13, 0.0  ;;  %v364_v25 = vmul.f32 %v357_v47, %v309_v17 }
  0xd5   : > { %v387_v30 = vsel %vm335_vm0, %v365_v24, 0.0 }
  0xd6   : > { %v421_v38 = vmul.f32 %v419_v35, %v320_v33  ;;  %v420_v39 = vmul.f32 %v419_v35, %v319_v34  ;;  %v423_v43 = vmul.f32 %v419_v35, %v322_v36  ;;  %v422_v44 = vmul.f32 %v419_v35, %v321_v37 }
  0xd7   : > { %v425_v50 = vmul.f32 %v419_v35, %v324_v45  ;;  %v424_v51 = vmul.f32 %v419_v35, %v323_v46  ;;  %v384_v31 = vsel %vm335_vm0, %v364_v25, 0.0  ;;  %v427_v32 = vmul.f32 %v419_v35, %v326_v28 }
  0xd8   : > { %v431_v41 = vsel %vm335_vm0, %v421_v38, 0.0  ;;  %v428_v42 = vsel %vm335_vm0, %v420_v39, 0.0  ;;  %v437_v48 = vsel %vm335_vm0, %v423_v43, 0.0  ;;  %v434_v49 = vsel %vm335_vm0, %v422_v44, 0.0 }
  0xd9   : > { %432 = vadd.xlane.f32.xlu1 %v431_v41  ;;  %429 = vadd.xlane.f32.xlu0 %v428_v42  ;;  %v443_v54 = vsel %vm335_vm0, %v425_v50, 0.0  ;;  %v440_v55 = vsel %vm335_vm0, %v424_v51, 0.0  ;;  %v426_v33 = vmul.f32 %v419_v35, %v325_v29  ;;  %v449_v34 = vsel %vm335_vm0, %v427_v32, 0.0 }
  0xdb   : > { %v446_v36 = vsel %vm335_vm0, %v426_v33, 0.0 }
  0xdd   : > { %438 = vadd.xlane.f32.xlu1 %v437_v48  ;;  %435 = vadd.xlane.f32.xlu0 %v434_v49 }
  0xe1   : > { %444 = vadd.xlane.f32.xlu1 %v443_v54  ;;  %441 = vadd.xlane.f32.xlu0 %v440_v55 }
  0xe5   : > { %370 = vadd.xlane.f32.xlu1 %v369_v60  ;;  %367 = vadd.xlane.f32.xlu0 %v366_v61 }
  0xe9   : > { %376 = vadd.xlane.f32.xlu1 %v375_v8  ;;  %373 = vadd.xlane.f32.xlu0 %v372_v9 }
  0xed   : > { %382 = vadd.xlane.f32.xlu1 %v381_v20  ;;  %379 = vadd.xlane.f32.xlu0 %v378_v21 }
  0xf1   : > { %388 = vadd.xlane.f32.xlu1 %v387_v30  ;;  %385 = vadd.xlane.f32.xlu0 %v384_v31 }
  0xf5   : > { %450 = vadd.xlane.f32.xlu1 %v449_v34  ;;  %447 = vadd.xlane.f32.xlu0 %v446_v36 }
 0x162   : > { %v433_v37 = vpop.xlane.xlu1 %432  ;;  %v430_v38 = vpop.xlane.xlu0 %429 }
 0x166   : > { %v439_v39 = vpop.xlane.xlu1 %438  ;;  %v436_v40 = vpop.xlane.xlu0 %435 }
 0x16a   : > { %v445_v41 = vpop.xlane.xlu1 %444  ;;  %v442_v42 = vpop.xlane.xlu0 %441 }
 0x16e   : > { %v371_v43 = vpop.xlane.xlu1 %370  ;;  %v368_v44 = vpop.xlane.xlu0 %367 }
 0x16f   : > { %v453_v45 = vadd.f32 %v433_v37, %v371_v43  ;;  %v452_v46 = vadd.f32 %v430_v38, %v368_v44 }
 0x171   : > { %v632_v47 = vmul.f32 -1.442695, %v453_v45  ;;  %v631_v35 = vmul.f32 -1.442695, %v452_v46 }
 0x172   : > { %v377_v48 = vpop.xlane.xlu1 %376  ;;  %v374_v49 = vpop.xlane.xlu0 %373 }
 0x173   : > { %687 = vpow2.f32 %v632_v47  ;;  %v455_v50 = vadd.f32 %v439_v39, %v377_v48  ;;  %v454_v51 = vadd.f32 %v436_v40, %v374_v49 }
 0x174   : > { %689 = vpow2.f32 %v631_v35 }
 0x175   : > { %v634_v52 = vmul.f32 -1.442695, %v455_v50  ;;  %v633_v53 = vmul.f32 -1.442695, %v454_v51 }
 0x176   : > { %v383_v54 = vpop.xlane.xlu1 %382  ;;  %v380_v55 = vpop.xlane.xlu0 %379 }
 0x177   : > { %691 = vpow2.f32 %v634_v52  ;;  %v457_v56 = vadd.f32 %v445_v41, %v383_v54  ;;  %v456_v57 = vadd.f32 %v442_v42, %v380_v55 }
 0x178   : > { %693 = vpow2.f32 %v633_v53 }
 0x179   : > { %v636_v58 = vmul.f32 -1.442695, %v457_v56  ;;  %v635_v59 = vmul.f32 -1.442695, %v456_v57 }
 0x17a   : > { %v389_v60 = vpop.xlane.xlu1 %388  ;;  %v386_v61 = vpop.xlane.xlu0 %385 }
 0x17b   : > { %695 = vpow2.f32 %v636_v58 }
 0x17c   : > { %697 = vpow2.f32 %v635_v59 }
 0x17e   : > { %v451_v62 = vpop.xlane.xlu1 %450  ;;  %v448_v63 = vpop.xlane.xlu0 %447 }
 0x17f   : > { %v459_v3 = vadd.f32 %v451_v62, %v389_v60  ;;  %v458_v7 = vadd.f32 %v448_v63, %v386_v61 }
 0x180   : > { %v688_v8 = vpop.eup %687 }
 0x181   : > { %v690_v9 = vpop.eup %689  ;;  %v485_v12 = vadd.f32 1.0, %v688_v8  ;;  %v638_v13 = vmul.f32 -1.442695, %v459_v3  ;;  %v637_v17 = vmul.f32 -1.442695, %v458_v7 }
 0x182   : > { %v484_v16 = vadd.f32 1.0, %v690_v9 }
 0x183   : > { %699 = vrcp.f32 %v485_v12 }
 0x184   : > { %v692_v20 = vpop.eup %691  ;;  %701 = vrcp.f32 %v484_v16 }
 0x185   : > { %v694_v21 = vpop.eup %693  ;;  %v487_v24 = vadd.f32 1.0, %v692_v20  ;;  %703 = vpow2.f32 %v638_v13 }
 0x186   : > { %v486_v25 = vadd.f32 1.0, %v694_v21  ;;  %705 = vpow2.f32 %v637_v17 }
 0x187   : > { %707 = vrcp.f32 %v487_v24 }
 0x188   : > { %v696_v28 = vpop.eup %695  ;;  %709 = vrcp.f32 %v486_v25 }
 0x189   : > { %v698_v29 = vpop.eup %697  ;;  %v489_v30 = vadd.f32 1.0, %v696_v28 }
 0x18a   : > { %v488_v31 = vadd.f32 1.0, %v698_v29 }
 0x18b   : > { %711 = vrcp.f32 %v489_v30 }
 0x18c   : > { %713 = vrcp.f32 %v488_v31 }
 0x190   : > { %v700_v32 = vpop.eup %699 }
 0x191   : > { %v702_v33 = vpop.eup %701  ;;  %v509_v34 = vadd.f32 1.0, %v700_v32 }
 0x192   : > { %v704_v36 = vpop.eup %703  ;;  %v508_v37 = vadd.f32 1.0, %v702_v33 }
 0x193   : > { %v706_v38 = vpop.eup %705  ;;  %v518_v39 = vmul.f32 %v509_v34, %v884_v5  ;;  %v519_v40 = vmul.f32 %v509_v34, %v887_v6  ;;  %v491_v41 = vadd.f32 1.0, %v704_v36 }
 0x194   : > { %v708_v42 = vpop.eup %707  ;;  %v516_v43 = vmul.f32 %v508_v37, %v876_v2  ;;  %v517_v44 = vmul.f32 %v508_v37, %v881_v4  ;;  %v490_v45 = vadd.f32 1.0, %v706_v38 }
 0x195   : > { %v710_v46 = vpop.eup %709  ;;  %534 = vst [vmem:[%s1084_s12 + $0x10] sm:$0xff] %v518_v39  ;;  %535 = vst [vmem:[%s1084_s12 + $0x18] sm:$0xff] %v519_v40  ;;  %v511_v5 = vadd.f32 1.0, %v708_v42  ;;  %715 = vrcp.f32 %v491_v41 }
 0x196   : > { %532 = vst [vmem:[%s1084_s12] sm:$0xff] %v516_v43  ;;  %533 = vst [vmem:[%s1084_s12 + $0x8] sm:$0xff] %v517_v44  ;;  %v510_v2 = vadd.f32 1.0, %v710_v46  ;;  %717 = vrcp.f32 %v490_v45 }
 0x197   : > { %v522_v4 = vmul.f32 %v511_v5, %v896_v10  ;;  %v523_v6 = vmul.f32 %v511_v5, %v899_v11 }
 0x198   : > { %v712_v47 = vpop.eup %711  ;;  %v520_v35 = vmul.f32 %v510_v2, %v870_v0  ;;  %v521_v48 = vmul.f32 %v510_v2, %v873_v1 }
 0x199   : > { %v714_v49 = vpop.eup %713  ;;  %538 = vst [vmem:[%s1084_s12 + $0x30] sm:$0xff] %v522_v4  ;;  %539 = vst [vmem:[%s1084_s12 + $0x38] sm:$0xff] %v523_v6  ;;  %v513_v50 = vadd.f32 1.0, %v712_v47 }
 0x19a   : > { %536 = vst [vmem:[%s1084_s12 + $0x20] sm:$0xff] %v520_v35  ;;  %537 = vst [vmem:[%s1084_s12 + $0x28] sm:$0xff] %v521_v48  ;;  %v512_v10 = vadd.f32 1.0, %v714_v49 }
 0x19b   : > { %v526_v51 = vmul.f32 %v513_v50, %v916_v18  ;;  %v527_v11 = vmul.f32 %v513_v50, %v919_v19 }
 0x19c   : > { %v524_v52 = vmul.f32 %v512_v10, %v906_v14  ;;  %v525_v0 = vmul.f32 %v512_v10, %v909_v15 }
 0x19d   : > { %542 = vst [vmem:[%s1084_s12 + $0x50] sm:$0xff] %v526_v51  ;;  %543 = vst [vmem:[%s1084_s12 + $0x58] sm:$0xff] %v527_v11 }
 0x19e   : > { %540 = vst [vmem:[%s1084_s12 + $0x40] sm:$0xff] %v524_v52  ;;  %541 = vst [vmem:[%s1084_s12 + $0x48] sm:$0xff] %v525_v0 }
 0x1a2   : > { %v716_v1 = vpop.eup %715 }
 0x1a3   : > { %v718_v53 = vpop.eup %717  ;;  %v515_v18 = vadd.f32 1.0, %v716_v1 }
 0x1a4   : > { %v514_v19 = vadd.f32 1.0, %v718_v53 }
 0x1a5   : > { %v530_v14 = vmul.f32 %v515_v18, %v936_v26  ;;  %v531_v15 = vmul.f32 %v515_v18, %v939_v27 }
 0x1a6   : > { %v528_v54 = vmul.f32 %v514_v19, %v926_v22  ;;  %v529_v55 = vmul.f32 %v514_v19, %v929_v23 }
 0x1a7   : > { %546 = vst [vmem:[%s1084_s12 + $0x70] sm:$0xff] %v530_v14  ;;  %547 = vst [vmem:[%s1084_s12 + $0x78] sm:$0xff] %v531_v15 }
 0x1a8   : > { %544 = vst [vmem:[%s1084_s12 + $0x60] sm:$0xff] %v528_v54  ;;  %545 = vst [vmem:[%s1084_s12 + $0x68] sm:$0xff] %v529_v55 }
 0x1a9   : > { %732 = shalt.err (!%p729_p3)
}
 0x1aa   : > { %s733_s6 = scalar_lea.hbm %s1113_s17, 2048  ;;  %s737_s9 = scalar_lea.hbm %s1170_s5, 4096 }
 0x1ab   : > { %p734_p4 = scmp.ne.s32.totalorder %s1113_s17, %s733_s6  ;;  %p738_p9 = scmp.lt.s32.totalorder %s1113_s17, %s1170_s5 }
 0x1ac   : > { %p739_p10 = scmp.lt.s32.totalorder %s737_s9, %s733_s6 }
 0x1ad   : > { %p735_p7 = pnand %p734_p4, %p852_p5 }
 0x1ae   : > { %p740_p11 = por %p739_p10, %p738_p9 }
 0x1af   : > { %p736_p8 = pneg %p735_p7 }
 0x1b1   : > { %p741_p12 = pnand %p740_p11, %p736_p8 }
 0x1b3   : > { %744 = shalt.err (!%p741_p12)
}
 0x1b4   : > { %s782_s12 = smov 256   ;;  %s783_s13 = smov 16  }
 0x1b5   : > { %646 = dma.vmem_to_hbm [thread:$0]  (%p852_p5), %s1115_s14, 2048, %s1113_s17, %s1125_s22, %s782_s12, %s782_s12, %s783_s13  }
 0x1b6 PF: > { %p652_p13 = scmp.ge.s32.totalorder %s779_s21, 2  ;;  %s577_s15 = sand.u32 1, %s767_s18  }
 0x1b7   : > { %s578_s16 = scalar_lea.sflag [#allocation3], %s577_s15 }
 0x1b8   : > { %p649_p0 = pnand %p652_p13, %p856_p6 }
 0x1ba   : > { %p650_p1 = pneg %p649_p0 }
 0x1bc   : > { %762 = dma.done.wait (%p650_p1), %s578_s16, 2048  }
 0x1bd   : > { %764 = vsyncadd (%p650_p1), %s578_s16, 4294965248  ;;  %p15_p2 = scmp.ge.s32.totalorder %s839_s24, 4   ;;  %s1173_s18 = smov %s771_s19 }
 0x1be   : > { %s1174_s19 = smov %s775_s20  ;;  %s1175_s20 = smov %s850_s27 }
 0x1bf   : > { %s1176_s21 = smov %s839_s24  ;;  %17 = sbr.rel (!%p15_p2) target bundleno = 3 (0x3), region = 75 }
 0x1c4   :  { %583 = vsyncpa [#allocation3], 1 }
 0x1c5   :  { %585 = vsyncpa [#allocation3 + $0x1], 1 }

</bundles_post_ra>
